<compile_context>
chip_gen: v7x
topology: tpu7x:2x2x1
jax: 0.10.0
libtpu: 0.0.40
codegen_flags: <defaults>
</compile_context>

<pallas_src>
import jax
import jax.numpy as jnp
from jax.experimental import pallas as pl
from jax.experimental.pallas import tpu as pltpu

H_DIM = 2          # hidden dim of Extractor / Predictor
NUM_STATE = 3      # fc / predictor output width
IN_FEAT = 3        # input feature dim of f1 / f0

# ---- flat parameter layout (float32, row-major [in, out] per weight) ----
WE_OFF, BE_OFF = 0, 6            # Extractor.NN : (3, 2), (2,)
W1_OFF, B1_OFF = 8, 14           # Predictor.NN1: (2, 3), (3,)
W0_OFF, B0_OFF = 17, 23          # Predictor.NN0: (2, 3), (3,)
WFC_OFF, BFC_OFF = 26, 32        # Tra.fc       : (2, 3), (3,)
N_PARAMS = 35


def tra_kernel(p_ref, x_ref, out_ref):
    # x_ref: (2, 2, N, 3). axis0: 0 = stacked features [f1; f0], 1 = gumbel noise.
    f = x_ref[0]        # (2, N, IN_FEAT)   half 0 = f1, half 1 = f0
    g = x_ref[1]        # (2, N, NUM_STATE) gumbel noise, same stacking

    def lin_col(x_cols, w_off, b_off, j, in_dim, out_dim):
        """Column j of (x @ W + b) as an unrolled VPU FMA; W/b scalars from SMEM."""
        acc = x_cols[0] * p_ref[w_off + j]                    # k = 0
        for k in range(1, in_dim):
            acc = acc + x_cols[k] * p_ref[w_off + k * out_dim + j]
        return acc + p_ref[b_off + j]

    # Input feature columns, each (2, N, 1).
    f_cols = [f[..., k:k + 1] for k in range(IN_FEAT)]

    # Extractor (shared Linear) applied once to the stacked slab -> emb columns.
    emb = [lin_col(f_cols, WE_OFF, BE_OFF, j, IN_FEAT, H_DIM)
           for j in range(H_DIM)]                              # each (2, N, 1)

    # Tra.fc on the stacked slab, plus gumbel noise -> logit columns.
    z = [lin_col(emb, WFC_OFF, BFC_OFF, j, H_DIM, NUM_STATE) + g[..., j:j + 1]
         for j in range(NUM_STATE)]                            # each (2, N, 1)

    # gumbel_softmax(out, tau=1, hard=False) == softmax(out + gumbel_noise).
    # Column-wise softmax: pure elementwise ops, reciprocal on the EUP slot.
    m = jnp.maximum(jnp.maximum(z[0], z[1]), z[2])
    e = [jnp.exp(zj - m) for zj in z]
    inv = pl.reciprocal(e[0] + e[1] + e[2], approx=True)
    prob = [ej * inv for ej in e]                              # each (2, N, 1)

    # Predictors: NN1 on the f1 half, NN0 on the f0 half (free leading-axis slice).
    emb1 = [c[0:1] for c in emb]                               # each (1, N, 1)
    emb0 = [c[1:2] for c in emb]
    preds1 = [lin_col(emb1, W1_OFF, B1_OFF, j, H_DIM, NUM_STATE)
              for j in range(NUM_STATE)]                       # each (1, N, 1)
    preds0 = [lin_col(emb0, W0_OFF, B0_OFF, j, H_DIM, NUM_STATE)
              for j in range(NUM_STATE)]

    # Train=True branch: final_pred = sum(preds * prob, dim=-1) (elementwise).
    fp1 = preds1[0] * prob[0][0:1]
    fp0 = preds0[0] * prob[0][1:2]
    for j in range(1, NUM_STATE):
        fp1 = fp1 + preds1[j] * prob[j][0:1]
        fp0 = fp0 + preds0[j] * prob[j][1:2]

    # Packed output slab (2, N, 8): [preds(3) | prob(3) | fp(1) | pad(1)].
    for j in range(NUM_STATE):
        out_ref[0:1, :, j:j + 1] = preds1[j]
        out_ref[1:2, :, j:j + 1] = preds0[j]
        out_ref[:, :, NUM_STATE + j:NUM_STATE + j + 1] = prob[j]
    out_ref[0:1, :, 2 * NUM_STATE:2 * NUM_STATE + 1] = fp1
    out_ref[1:2, :, 2 * NUM_STATE:2 * NUM_STATE + 1] = fp0
    out_ref[:, :, 7:8] = jnp.zeros_like(prob[0])


def tra_forward(f1, f0, packed_params, gumbel_noise):
    """Runs the Tra forward (Train=True) in a single Pallas TPU kernel.

    f1, f0:        (N, IN_FEAT) float32
    packed_params: (N_PARAMS,)  float32  (see pack_params)
    gumbel_noise:  (2, N, NUM_STATE) float32, [noise for emb1 rows; emb0 rows]
    """
    n = f1.shape[0]
    # One packed VMEM input: axis0 selects {features, gumbel}; IN_FEAT == NUM_STATE.
    x = jnp.stack([jnp.stack([f1, f0], axis=0), gumbel_noise], axis=0)  # (2,2,N,3)

    out = pl.pallas_call(
        tra_kernel,
        out_shape=jax.ShapeDtypeStruct((2, n, 8), jnp.float32),
        in_specs=[
            pl.BlockSpec(memory_space=pltpu.MemorySpace.SMEM),   # packed params
            pl.BlockSpec(memory_space=pltpu.MemorySpace.VMEM),   # packed f + gumbel
        ],
        out_specs=pl.BlockSpec(memory_space=pltpu.MemorySpace.VMEM),
    )(packed_params, x)

    preds1 = out[0, :, 0:NUM_STATE]
    preds0 = out[1, :, 0:NUM_STATE]
    prob = out[:, :, NUM_STATE:2 * NUM_STATE].reshape(2 * n, NUM_STATE)
    fp1 = out[0, :, 2 * NUM_STATE]
    fp0 = out[1, :, 2 * NUM_STATE]
    return fp1, fp0, preds1, preds0, prob


def init_params(key):
    """Deterministic synthetic parameters. Weights stored pre-transposed so the
    kernel computes x @ W (torch Linear stores W as [out, in] and does x @ W.T)."""
    ks = jax.random.split(key, 8)
    u = lambda k, shape, bound: jax.random.uniform(
        k, shape, jnp.float32, minval=-bound, maxval=bound)
    return {
        "we":  u(ks[0], (IN_FEAT, H_DIM), 1.0 / jnp.sqrt(IN_FEAT)),
        "be":  u(ks[1], (1, H_DIM),       1.0 / jnp.sqrt(IN_FEAT)),
        "w1":  u(ks[2], (H_DIM, NUM_STATE), 1.0 / jnp.sqrt(H_DIM)),
        "b1":  u(ks[3], (1, NUM_STATE),     1.0 / jnp.sqrt(H_DIM)),
        "w0":  u(ks[4], (H_DIM, NUM_STATE), 1.0 / jnp.sqrt(H_DIM)),
        "b0":  u(ks[5], (1, NUM_STATE),     1.0 / jnp.sqrt(H_DIM)),
        "wfc": u(ks[6], (H_DIM, NUM_STATE), 1.0 / jnp.sqrt(H_DIM)),
        "bfc": u(ks[7], (1, NUM_STATE),     1.0 / jnp.sqrt(H_DIM)),
    }


def pack_params(params):
    """Flatten all weights/biases into one small f32 array for SMEM."""
    packed = jnp.concatenate([
        params["we"].reshape(-1), params["be"].reshape(-1),
        params["w1"].reshape(-1), params["b1"].reshape(-1),
        params["w0"].reshape(-1), params["b0"].reshape(-1),
        params["wfc"].reshape(-1), params["bfc"].reshape(-1),
    ]).astype(jnp.float32)
    assert packed.shape == (N_PARAMS,)
    return packed


def tra_reference(f1, f0, params, gumbel_noise):
    """Pure-JAX reference of the Train=True forward."""
    n = f1.shape[0]
    emb1 = f1 @ params["we"] + params["be"]
    emb0 = f0 @ params["we"] + params["be"]
    preds1 = emb1 @ params["w1"] + params["b1"]
    preds0 = emb0 @ params["w0"] + params["b0"]
    emb = jnp.concatenate([emb1, emb0], axis=0)
    out = emb @ params["wfc"] + params["bfc"]
    prob = jax.nn.softmax(out + gumbel_noise.reshape(2 * n, NUM_STATE), axis=-1)
    fp1 = jnp.sum(preds1 * prob[:n], axis=-1)
    fp0 = jnp.sum(preds0 * prob[n:], axis=-1)
    return fp1, fp0, preds1, preds0, prob


if __name__ == "__main__":
    key = jax.random.PRNGKey(0)
    k_params, k_f1, k_f0, k_gumbel = jax.random.split(key, 4)

    N = 8  # small batch (multiple of 8 keeps sublane tiles clean)
    params = init_params(k_params)
    packed = pack_params(params)
    f1 = jax.random.normal(k_f1, (N, IN_FEAT), jnp.float32)
    f0 = jax.random.normal(k_f0, (N, IN_FEAT), jnp.float32)
    # Gumbel noise for the concatenated [emb1; emb0], stacked as (2, N, 3).
    gumbel_noise = jax.random.gumbel(k_gumbel, (2, N, NUM_STATE), jnp.float32)

    fp1, fp0, preds1, preds0, prob = tra_forward(f1, f0, packed, gumbel_noise)
    jax.block_until_ready((fp1, fp0, preds1, preds0, prob))

    # Shape checks.
    assert fp1.shape == (N,) and fp0.shape == (N,)
    assert preds1.shape == (N, NUM_STATE) and preds0.shape == (N, NUM_STATE)
    assert prob.shape == (2 * N, NUM_STATE)

    # Numerical check against the pure-JAX reference.
    r_fp1, r_fp0, r_preds1, r_preds0, r_prob = tra_reference(f1, f0, params, gumbel_noise)
    assert bool(jnp.allclose(preds1, r_preds1, atol=1e-5))
    assert bool(jnp.allclose(preds0, r_preds0, atol=1e-5))
    # prob / final preds go through the approx (EUP) reciprocal -> looser tolerance.
    assert bool(jnp.allclose(prob, r_prob, atol=5e-3))
    assert bool(jnp.allclose(fp1, r_fp1, atol=5e-3))
    assert bool(jnp.allclose(fp0, r_fp0, atol=5e-3))
    assert bool(jnp.allclose(jnp.sum(prob, axis=-1), 1.0, atol=5e-3))

    print("KERNEL_OK")
</pallas_src>

<mosaic_0001>
module attributes {stable_mosaic.version = 11 : i64} {
  func.func @tra_kernel(%arg0: memref<35xf32, #tpu.memory_space<smem>>, %arg1: memref<2x2x8x3xf32, #tpu.memory_space<vmem>>, %arg2: memref<2x8x8xf32, #tpu.memory_space<vmem>>) attributes {dimension_semantics = [], scalar_prefetch = 0 : i64, scratch_operands = 0 : i64, tpu.core_type = #tpu.core_type<tc>} {
    %c0 = arith.constant 0 : index
    %c0_0 = arith.constant 0 : index
    %c0_1 = arith.constant 0 : index
    %c0_2 = arith.constant 0 : index
    %0 = vector.load %arg1[%c0, %c0_0, %c0_1, %c0_2] : memref<2x2x8x3xf32, #tpu.memory_space<vmem>>, vector<1x2x8x3xf32>
    %1 = vector.shape_cast %0 : vector<1x2x8x3xf32> to vector<2x8x3xf32>
    %c1 = arith.constant 1 : index
    %c0_3 = arith.constant 0 : index
    %c0_4 = arith.constant 0 : index
    %c0_5 = arith.constant 0 : index
    %2 = vector.load %arg1[%c1, %c0_3, %c0_4, %c0_5] : memref<2x2x8x3xf32, #tpu.memory_space<vmem>>, vector<1x2x8x3xf32>
    %3 = vector.shape_cast %2 : vector<1x2x8x3xf32> to vector<2x8x3xf32>
    %4 = vector.extract_strided_slice %1 {offsets = [0, 0, 0], sizes = [2, 8, 1], strides = [1, 1, 1]} : vector<2x8x3xf32> to vector<2x8x1xf32>
    %5 = vector.extract_strided_slice %1 {offsets = [0, 0, 1], sizes = [2, 8, 1], strides = [1, 1, 1]} : vector<2x8x3xf32> to vector<2x8x1xf32>
    %6 = vector.extract_strided_slice %1 {offsets = [0, 0, 2], sizes = [2, 8, 1], strides = [1, 1, 1]} : vector<2x8x3xf32> to vector<2x8x1xf32>
    %c0_6 = arith.constant 0 : index
    %7 = memref.load %arg0[%c0_6] : memref<35xf32, #tpu.memory_space<smem>>
    %8 = vector.broadcast %7 : f32 to vector<2x8x1xf32>
    %9 = arith.mulf %4, %8 : vector<2x8x1xf32>
    %c2 = arith.constant 2 : index
    %10 = memref.load %arg0[%c2] : memref<35xf32, #tpu.memory_space<smem>>
    %11 = vector.broadcast %10 : f32 to vector<2x8x1xf32>
    %12 = arith.mulf %5, %11 : vector<2x8x1xf32>
    %13 = arith.addf %9, %12 : vector<2x8x1xf32>
    %c4 = arith.constant 4 : index
    %14 = memref.load %arg0[%c4] : memref<35xf32, #tpu.memory_space<smem>>
    %15 = vector.broadcast %14 : f32 to vector<2x8x1xf32>
    %16 = arith.mulf %6, %15 : vector<2x8x1xf32>
    %17 = arith.addf %13, %16 : vector<2x8x1xf32>
    %c6 = arith.constant 6 : index
    %18 = memref.load %arg0[%c6] : memref<35xf32, #tpu.memory_space<smem>>
    %19 = vector.broadcast %18 : f32 to vector<2x8x1xf32>
    %20 = arith.addf %17, %19 : vector<2x8x1xf32>
    %c1_7 = arith.constant 1 : index
    %21 = memref.load %arg0[%c1_7] : memref<35xf32, #tpu.memory_space<smem>>
    %22 = vector.broadcast %21 : f32 to vector<2x8x1xf32>
    %23 = arith.mulf %4, %22 : vector<2x8x1xf32>
    %c3 = arith.constant 3 : index
    %24 = memref.load %arg0[%c3] : memref<35xf32, #tpu.memory_space<smem>>
    %25 = vector.broadcast %24 : f32 to vector<2x8x1xf32>
    %26 = arith.mulf %5, %25 : vector<2x8x1xf32>
    %27 = arith.addf %23, %26 : vector<2x8x1xf32>
    %c5 = arith.constant 5 : index
    %28 = memref.load %arg0[%c5] : memref<35xf32, #tpu.memory_space<smem>>
    %29 = vector.broadcast %28 : f32 to vector<2x8x1xf32>
    %30 = arith.mulf %6, %29 : vector<2x8x1xf32>
    %31 = arith.addf %27, %30 : vector<2x8x1xf32>
    %c7 = arith.constant 7 : index
    %32 = memref.load %arg0[%c7] : memref<35xf32, #tpu.memory_space<smem>>
    %33 = vector.broadcast %32 : f32 to vector<2x8x1xf32>
    %34 = arith.addf %31, %33 : vector<2x8x1xf32>
    %c26 = arith.constant 26 : index
    %35 = memref.load %arg0[%c26] : memref<35xf32, #tpu.memory_space<smem>>
    %36 = vector.broadcast %35 : f32 to vector<2x8x1xf32>
    %37 = arith.mulf %20, %36 : vector<2x8x1xf32>
    %c29 = arith.constant 29 : index
    %38 = memref.load %arg0[%c29] : memref<35xf32, #tpu.memory_space<smem>>
    %39 = vector.broadcast %38 : f32 to vector<2x8x1xf32>
    %40 = arith.mulf %34, %39 : vector<2x8x1xf32>
    %41 = arith.addf %37, %40 : vector<2x8x1xf32>
    %c32 = arith.constant 32 : index
    %42 = memref.load %arg0[%c32] : memref<35xf32, #tpu.memory_space<smem>>
    %43 = vector.broadcast %42 : f32 to vector<2x8x1xf32>
    %44 = arith.addf %41, %43 : vector<2x8x1xf32>
    %45 = vector.extract_strided_slice %3 {offsets = [0, 0, 0], sizes = [2, 8, 1], strides = [1, 1, 1]} : vector<2x8x3xf32> to vector<2x8x1xf32>
    %46 = arith.addf %44, %45 : vector<2x8x1xf32>
    %c27 = arith.constant 27 : index
    %47 = memref.load %arg0[%c27] : memref<35xf32, #tpu.memory_space<smem>>
    %48 = vector.broadcast %47 : f32 to vector<2x8x1xf32>
    %49 = arith.mulf %20, %48 : vector<2x8x1xf32>
    %c30 = arith.constant 30 : index
    %50 = memref.load %arg0[%c30] : memref<35xf32, #tpu.memory_space<smem>>
    %51 = vector.broadcast %50 : f32 to vector<2x8x1xf32>
    %52 = arith.mulf %34, %51 : vector<2x8x1xf32>
    %53 = arith.addf %49, %52 : vector<2x8x1xf32>
    %c33 = arith.constant 33 : index
    %54 = memref.load %arg0[%c33] : memref<35xf32, #tpu.memory_space<smem>>
    %55 = vector.broadcast %54 : f32 to vector<2x8x1xf32>
    %56 = arith.addf %53, %55 : vector<2x8x1xf32>
    %57 = vector.extract_strided_slice %3 {offsets = [0, 0, 1], sizes = [2, 8, 1], strides = [1, 1, 1]} : vector<2x8x3xf32> to vector<2x8x1xf32>
    %58 = arith.addf %56, %57 : vector<2x8x1xf32>
    %c28 = arith.constant 28 : index
    %59 = memref.load %arg0[%c28] : memref<35xf32, #tpu.memory_space<smem>>
    %60 = vector.broadcast %59 : f32 to vector<2x8x1xf32>
    %61 = arith.mulf %20, %60 : vector<2x8x1xf32>
    %c31 = arith.constant 31 : index
    %62 = memref.load %arg0[%c31] : memref<35xf32, #tpu.memory_space<smem>>
    %63 = vector.broadcast %62 : f32 to vector<2x8x1xf32>
    %64 = arith.mulf %34, %63 : vector<2x8x1xf32>
    %65 = arith.addf %61, %64 : vector<2x8x1xf32>
    %c34 = arith.constant 34 : index
    %66 = memref.load %arg0[%c34] : memref<35xf32, #tpu.memory_space<smem>>
    %67 = vector.broadcast %66 : f32 to vector<2x8x1xf32>
    %68 = arith.addf %65, %67 : vector<2x8x1xf32>
    %69 = vector.extract_strided_slice %3 {offsets = [0, 0, 2], sizes = [2, 8, 1], strides = [1, 1, 1]} : vector<2x8x3xf32> to vector<2x8x1xf32>
    %70 = arith.addf %68, %69 : vector<2x8x1xf32>
    %71 = arith.maximumf %46, %58 : vector<2x8x1xf32>
    %72 = arith.maximumf %71, %70 : vector<2x8x1xf32>
    %73 = arith.subf %46, %72 : vector<2x8x1xf32>
    %74 = math.exp %73 : vector<2x8x1xf32>
    %75 = arith.subf %58, %72 : vector<2x8x1xf32>
    %76 = math.exp %75 : vector<2x8x1xf32>
    %77 = arith.subf %70, %72 : vector<2x8x1xf32>
    %78 = math.exp %77 : vector<2x8x1xf32>
    %79 = arith.addf %74, %76 : vector<2x8x1xf32>
    %80 = arith.addf %79, %78 : vector<2x8x1xf32>
    %81 = tpu.reciprocal %80 {approx = true} : vector<2x8x1xf32> -> vector<2x8x1xf32>
    %82 = arith.mulf %74, %81 : vector<2x8x1xf32>
    %83 = arith.mulf %76, %81 : vector<2x8x1xf32>
    %84 = arith.mulf %78, %81 : vector<2x8x1xf32>
    %85 = vector.extract_strided_slice %20 {offsets = [0, 0, 0], sizes = [1, 8, 1], strides = [1, 1, 1]} : vector<2x8x1xf32> to vector<1x8x1xf32>
    %86 = vector.extract_strided_slice %34 {offsets = [0, 0, 0], sizes = [1, 8, 1], strides = [1, 1, 1]} : vector<2x8x1xf32> to vector<1x8x1xf32>
    %87 = vector.extract_strided_slice %20 {offsets = [1, 0, 0], sizes = [1, 8, 1], strides = [1, 1, 1]} : vector<2x8x1xf32> to vector<1x8x1xf32>
    %88 = vector.extract_strided_slice %34 {offsets = [1, 0, 0], sizes = [1, 8, 1], strides = [1, 1, 1]} : vector<2x8x1xf32> to vector<1x8x1xf32>
    %c8 = arith.constant 8 : index
    %89 = memref.load %arg0[%c8] : memref<35xf32, #tpu.memory_space<smem>>
    %90 = vector.broadcast %89 : f32 to vector<1x8x1xf32>
    %91 = arith.mulf %85, %90 : vector<1x8x1xf32>
    %c11 = arith.constant 11 : index
    %92 = memref.load %arg0[%c11] : memref<35xf32, #tpu.memory_space<smem>>
    %93 = vector.broadcast %92 : f32 to vector<1x8x1xf32>
    %94 = arith.mulf %86, %93 : vector<1x8x1xf32>
    %95 = arith.addf %91, %94 : vector<1x8x1xf32>
    %c14 = arith.constant 14 : index
    %96 = memref.load %arg0[%c14] : memref<35xf32, #tpu.memory_space<smem>>
    %97 = vector.broadcast %96 : f32 to vector<1x8x1xf32>
    %98 = arith.addf %95, %97 : vector<1x8x1xf32>
    %c9 = arith.constant 9 : index
    %99 = memref.load %arg0[%c9] : memref<35xf32, #tpu.memory_space<smem>>
    %100 = vector.broadcast %99 : f32 to vector<1x8x1xf32>
    %101 = arith.mulf %85, %100 : vector<1x8x1xf32>
    %c12 = arith.constant 12 : index
    %102 = memref.load %arg0[%c12] : memref<35xf32, #tpu.memory_space<smem>>
    %103 = vector.broadcast %102 : f32 to vector<1x8x1xf32>
    %104 = arith.mulf %86, %103 : vector<1x8x1xf32>
    %105 = arith.addf %101, %104 : vector<1x8x1xf32>
    %c15 = arith.constant 15 : index
    %106 = memref.load %arg0[%c15] : memref<35xf32, #tpu.memory_space<smem>>
    %107 = vector.broadcast %106 : f32 to vector<1x8x1xf32>
    %108 = arith.addf %105, %107 : vector<1x8x1xf32>
    %c10 = arith.constant 10 : index
    %109 = memref.load %arg0[%c10] : memref<35xf32, #tpu.memory_space<smem>>
    %110 = vector.broadcast %109 : f32 to vector<1x8x1xf32>
    %111 = arith.mulf %85, %110 : vector<1x8x1xf32>
    %c13 = arith.constant 13 : index
    %112 = memref.load %arg0[%c13] : memref<35xf32, #tpu.memory_space<smem>>
    %113 = vector.broadcast %112 : f32 to vector<1x8x1xf32>
    %114 = arith.mulf %86, %113 : vector<1x8x1xf32>
    %115 = arith.addf %111, %114 : vector<1x8x1xf32>
    %c16 = arith.constant 16 : index
    %116 = memref.load %arg0[%c16] : memref<35xf32, #tpu.memory_space<smem>>
    %117 = vector.broadcast %116 : f32 to vector<1x8x1xf32>
    %118 = arith.addf %115, %117 : vector<1x8x1xf32>
    %c17 = arith.constant 17 : index
    %119 = memref.load %arg0[%c17] : memref<35xf32, #tpu.memory_space<smem>>
    %120 = vector.broadcast %119 : f32 to vector<1x8x1xf32>
    %121 = arith.mulf %87, %120 : vector<1x8x1xf32>
    %c20 = arith.constant 20 : index
    %122 = memref.load %arg0[%c20] : memref<35xf32, #tpu.memory_space<smem>>
    %123 = vector.broadcast %122 : f32 to vector<1x8x1xf32>
    %124 = arith.mulf %88, %123 : vector<1x8x1xf32>
    %125 = arith.addf %121, %124 : vector<1x8x1xf32>
    %c23 = arith.constant 23 : index
    %126 = memref.load %arg0[%c23] : memref<35xf32, #tpu.memory_space<smem>>
    %127 = vector.broadcast %126 : f32 to vector<1x8x1xf32>
    %128 = arith.addf %125, %127 : vector<1x8x1xf32>
    %c18 = arith.constant 18 : index
    %129 = memref.load %arg0[%c18] : memref<35xf32, #tpu.memory_space<smem>>
    %130 = vector.broadcast %129 : f32 to vector<1x8x1xf32>
    %131 = arith.mulf %87, %130 : vector<1x8x1xf32>
    %c21 = arith.constant 21 : index
    %132 = memref.load %arg0[%c21] : memref<35xf32, #tpu.memory_space<smem>>
    %133 = vector.broadcast %132 : f32 to vector<1x8x1xf32>
    %134 = arith.mulf %88, %133 : vector<1x8x1xf32>
    %135 = arith.addf %131, %134 : vector<1x8x1xf32>
    %c24 = arith.constant 24 : index
    %136 = memref.load %arg0[%c24] : memref<35xf32, #tpu.memory_space<smem>>
    %137 = vector.broadcast %136 : f32 to vector<1x8x1xf32>
    %138 = arith.addf %135, %137 : vector<1x8x1xf32>
    %c19 = arith.constant 19 : index
    %139 = memref.load %arg0[%c19] : memref<35xf32, #tpu.memory_space<smem>>
    %140 = vector.broadcast %139 : f32 to vector<1x8x1xf32>
    %141 = arith.mulf %87, %140 : vector<1x8x1xf32>
    %c22 = arith.constant 22 : index
    %142 = memref.load %arg0[%c22] : memref<35xf32, #tpu.memory_space<smem>>
    %143 = vector.broadcast %142 : f32 to vector<1x8x1xf32>
    %144 = arith.mulf %88, %143 : vector<1x8x1xf32>
    %145 = arith.addf %141, %144 : vector<1x8x1xf32>
    %c25 = arith.constant 25 : index
    %146 = memref.load %arg0[%c25] : memref<35xf32, #tpu.memory_space<smem>>
    %147 = vector.broadcast %146 : f32 to vector<1x8x1xf32>
    %148 = arith.addf %145, %147 : vector<1x8x1xf32>
    %149 = vector.extract_strided_slice %82 {offsets = [0, 0, 0], sizes = [1, 8, 1], strides = [1, 1, 1]} : vector<2x8x1xf32> to vector<1x8x1xf32>
    %150 = arith.mulf %98, %149 : vector<1x8x1xf32>
    %151 = vector.extract_strided_slice %82 {offsets = [1, 0, 0], sizes = [1, 8, 1], strides = [1, 1, 1]} : vector<2x8x1xf32> to vector<1x8x1xf32>
    %152 = arith.mulf %128, %151 : vector<1x8x1xf32>
    %153 = vector.extract_strided_slice %83 {offsets = [0, 0, 0], sizes = [1, 8, 1], strides = [1, 1, 1]} : vector<2x8x1xf32> to vector<1x8x1xf32>
    %154 = arith.mulf %108, %153 : vector<1x8x1xf32>
    %155 = arith.addf %150, %154 : vector<1x8x1xf32>
    %156 = vector.extract_strided_slice %83 {offsets = [1, 0, 0], sizes = [1, 8, 1], strides = [1, 1, 1]} : vector<2x8x1xf32> to vector<1x8x1xf32>
    %157 = arith.mulf %138, %156 : vector<1x8x1xf32>
    %158 = arith.addf %152, %157 : vector<1x8x1xf32>
    %159 = vector.extract_strided_slice %84 {offsets = [0, 0, 0], sizes = [1, 8, 1], strides = [1, 1, 1]} : vector<2x8x1xf32> to vector<1x8x1xf32>
    %160 = arith.mulf %118, %159 : vector<1x8x1xf32>
    %161 = arith.addf %155, %160 : vector<1x8x1xf32>
    %162 = vector.extract_strided_slice %84 {offsets = [1, 0, 0], sizes = [1, 8, 1], strides = [1, 1, 1]} : vector<2x8x1xf32> to vector<1x8x1xf32>
    %163 = arith.mulf %148, %162 : vector<1x8x1xf32>
    %164 = arith.addf %158, %163 : vector<1x8x1xf32>
    %c0_8 = arith.constant 0 : index
    %c0_9 = arith.constant 0 : index
    %c0_10 = arith.constant 0 : index
    %165 = vector.load %arg2[%c0_8, %c0_9, %c0_10] : memref<2x8x8xf32, #tpu.memory_space<vmem>>, vector<1x8x1xf32>
    tpu.vector_store %arg2[%c0_8, %c0_9, %c0_10], %98 {strides = array<i32>} : memref<2x8x8xf32, #tpu.memory_space<vmem>>, vector<1x8x1xf32>,
    %c1_11 = arith.constant 1 : index
    %c0_12 = arith.constant 0 : index
    %c0_13 = arith.constant 0 : index
    %166 = vector.load %arg2[%c1_11, %c0_12, %c0_13] : memref<2x8x8xf32, #tpu.memory_space<vmem>>, vector<1x8x1xf32>
    tpu.vector_store %arg2[%c1_11, %c0_12, %c0_13], %128 {strides = array<i32>} : memref<2x8x8xf32, #tpu.memory_space<vmem>>, vector<1x8x1xf32>,
    %c0_14 = arith.constant 0 : index
    %c0_15 = arith.constant 0 : index
    %c3_16 = arith.constant 3 : index
    %167 = vector.load %arg2[%c0_14, %c0_15, %c3_16] : memref<2x8x8xf32, #tpu.memory_space<vmem>>, vector<2x8x1xf32>
    tpu.vector_store %arg2[%c0_14, %c0_15, %c3_16], %82 {strides = array<i32>} : memref<2x8x8xf32, #tpu.memory_space<vmem>>, vector<2x8x1xf32>,
    %c0_17 = arith.constant 0 : index
    %c0_18 = arith.constant 0 : index
    %c1_19 = arith.constant 1 : index
    %168 = vector.load %arg2[%c0_17, %c0_18, %c1_19] : memref<2x8x8xf32, #tpu.memory_space<vmem>>, vector<1x8x1xf32>
    tpu.vector_store %arg2[%c0_17, %c0_18, %c1_19], %108 {strides = array<i32>} : memref<2x8x8xf32, #tpu.memory_space<vmem>>, vector<1x8x1xf32>,
    %c1_20 = arith.constant 1 : index
    %c0_21 = arith.constant 0 : index
    %c1_22 = arith.constant 1 : index
    %169 = vector.load %arg2[%c1_20, %c0_21, %c1_22] : memref<2x8x8xf32, #tpu.memory_space<vmem>>, vector<1x8x1xf32>
    tpu.vector_store %arg2[%c1_20, %c0_21, %c1_22], %138 {strides = array<i32>} : memref<2x8x8xf32, #tpu.memory_space<vmem>>, vector<1x8x1xf32>,
    %c0_23 = arith.constant 0 : index
    %c0_24 = arith.constant 0 : index
    %c4_25 = arith.constant 4 : index
    %170 = vector.load %arg2[%c0_23, %c0_24, %c4_25] : memref<2x8x8xf32, #tpu.memory_space<vmem>>, vector<2x8x1xf32>
    tpu.vector_store %arg2[%c0_23, %c0_24, %c4_25], %83 {strides = array<i32>} : memref<2x8x8xf32, #tpu.memory_space<vmem>>, vector<2x8x1xf32>,
    %c0_26 = arith.constant 0 : index
    %c0_27 = arith.constant 0 : index
    %c2_28 = arith.constant 2 : index
    %171 = vector.load %arg2[%c0_26, %c0_27, %c2_28] : memref<2x8x8xf32, #tpu.memory_space<vmem>>, vector<1x8x1xf32>
    tpu.vector_store %arg2[%c0_26, %c0_27, %c2_28], %118 {strides = array<i32>} : memref<2x8x8xf32, #tpu.memory_space<vmem>>, vector<1x8x1xf32>,
    %c1_29 = arith.constant 1 : index
    %c0_30 = arith.constant 0 : index
    %c2_31 = arith.constant 2 : index
    %172 = vector.load %arg2[%c1_29, %c0_30, %c2_31] : memref<2x8x8xf32, #tpu.memory_space<vmem>>, vector<1x8x1xf32>
    tpu.vector_store %arg2[%c1_29, %c0_30, %c2_31], %148 {strides = array<i32>} : memref<2x8x8xf32, #tpu.memory_space<vmem>>, vector<1x8x1xf32>,
    %c0_32 = arith.constant 0 : index
    %c0_33 = arith.constant 0 : index
    %c5_34 = arith.constant 5 : index
    %173 = vector.load %arg2[%c0_32, %c0_33, %c5_34] : memref<2x8x8xf32, #tpu.memory_space<vmem>>, vector<2x8x1xf32>
    tpu.vector_store %arg2[%c0_32, %c0_33, %c5_34], %84 {strides = array<i32>} : memref<2x8x8xf32, #tpu.memory_space<vmem>>, vector<2x8x1xf32>,
    %c0_35 = arith.constant 0 : index
    %c0_36 = arith.constant 0 : index
    %c6_37 = arith.constant 6 : index
    %174 = vector.load %arg2[%c0_35, %c0_36, %c6_37] : memref<2x8x8xf32, #tpu.memory_space<vmem>>, vector<1x8x1xf32>
    tpu.vector_store %arg2[%c0_35, %c0_36, %c6_37], %161 {strides = array<i32>} : memref<2x8x8xf32, #tpu.memory_space<vmem>>, vector<1x8x1xf32>,
    %c1_38 = arith.constant 1 : index
    %c0_39 = arith.constant 0 : index
    %c6_40 = arith.constant 6 : index
    %175 = vector.load %arg2[%c1_38, %c0_39, %c6_40] : memref<2x8x8xf32, #tpu.memory_space<vmem>>, vector<1x8x1xf32>
    tpu.vector_store %arg2[%c1_38, %c0_39, %c6_40], %164 {strides = array<i32>} : memref<2x8x8xf32, #tpu.memory_space<vmem>>, vector<1x8x1xf32>,
    %cst = arith.constant 0.000000e+00 : f32
    %176 = vector.broadcast %cst : f32 to vector<2x8x1xf32>
    %c0_41 = arith.constant 0 : index
    %c0_42 = arith.constant 0 : index
    %c7_43 = arith.constant 7 : index
    %177 = vector.load %arg2[%c0_41, %c0_42, %c7_43] : memref<2x8x8xf32, #tpu.memory_space<vmem>>, vector<2x8x1xf32>
    tpu.vector_store %arg2[%c0_41, %c0_42, %c7_43], %176 {strides = array<i32>} : memref<2x8x8xf32, #tpu.memory_space<vmem>>, vector<2x8x1xf32>,
    return
  }
}

</mosaic_0001>

<bundles_post_ra>
// kernel: tpu_custom_call.1
= control target key start
LH: loop header
LB: loop body
LE: loop exit
PB: predicated region body
PF: predicated region fallthrough
CT: control target
= control target key end

     0   :  { %7 = vsyncpa [#allocation4], 0  ;;  %s666_s0 = inlined_call_operand.vmem [shape: f32[35], index: 0, kind: input, shape index: {}]   ;;  %s667_s1 = inlined_call_operand.vmem [shape: f32[2,2,8,3], index: 1, kind: input, shape index: {}]   ;;  %s668_s2 = inlined_call_operand.hbm [shape: f32[2,8,8], index: 2, kind: output, shape index: {}]  }
   0x1   :  { %8 = vsyncpa [#allocation3], 0  ;;  %s15_s11 = sshll.u32 %s666_s0, 4  ;;  %s16_s11 = int_to_ptr.vmem [resolvable:$true] %s15_s11 }
   0x2   :  { %s423_s12 = scalar_lea.vmem %s16_s11, 16  ;;  %p428_p1 = scmp.lt.s32.totalorder %s16_s11, %s16_s11 }
   0x3   :  { %p424_p0 = scmp.ne.s32.totalorder %s16_s11, %s423_s12  ;;  %p429_p2 = scmp.lt.s32.totalorder %s423_s12, %s423_s12 }
   0x5   :  { %p430_p3 = por %p429_p2, %p428_p1 }
   0x7   :  { %p431_p4 = pnand %p430_p3, %p424_p0 }
   0x9   :  { %434 = shalt.err (!%p431_p4)
}
   0xa   :  { %s461_s13 = smov [#allocation2]  }
   0xb   :  { %18 = dma.vmem_to_smem %s16_s11, 16, %s461_s13, [#allocation4]  }
   0xc   :  { %457 = dma.done.wait [#allocation4], 16  }
   0xd   :  { %458 = vsyncadd [#allocation4], 4294967280 }
   0xe   :  { %24 = sfence }
   0xf   :  { %s364_s14 = sld [smem:[#allocation2 + $0x3]]  ;;  %s360_s15 = sld [smem:[#allocation2 + $0x2]]  ;;  %v25_v0 = vld [vmem:[%s667_s1] sm:$0xff]  ;;  %v498_v1 = vld [vmem:[%s667_s1 + $0x8] sm:$0xff]  ;;  %v507_v14 = vld [vmem:[%s667_s1 + $0x18] sm:$0xff]  ;;  %vm268_vm0 = vcmask 7168  }
  0x10   :  { %s361_s16 = sld [smem:[#allocation2 + $0x4]]  ;;  %s365_s20 = sld [smem:[#allocation2 + $0x5]]  ;;  %v512_v15 = vld [vmem:[%s667_s1 + $0x10] sm:$0xff]  ;;  %vm280_vm1 = vcmask 31768   ;;  %vm287_vm2 = vcmask 15368   ;;  %vm302_vm3 = vcmask 39968  }
  0x11   :  { %s462_s21 = smov 127   ;;  %s463_s22 = smov 126   ;;  %vm309_vm4 = vcmask 23568   ;;  %vm324_vm5 = vcmask 48168   ;;  %vm331_vm6 = vcmask 56368   ;;  %vm338_vm7 = vcmask 64568  }
  0x12   :  { %s518_s27 = sld [smem:[#allocation2 + $0x1]]  ;;  %s30_s28 = sld [smem:[#allocation2]] }
  0x13   :  { %s520_s29 = sld [smem:[#allocation2 + $0x6]]  ;;  %s522_s30 = sld [smem:[#allocation2 + $0x7]] }
  0x14   :  { %s524_s3 = sld [smem:[#allocation2 + $0x1a]]  ;;  %s526_s1 = sld [smem:[#allocation2 + $0x1d]] }
  0x15   :  { %v71_v2 = vstv %s364_s14  ;;  %v35_v4 = vstv %s360_s15  ;;  %s528_s4 = sld [smem:[#allocation2 + $0x1b]]  ;;  %s530_s5 = sld [smem:[#allocation2 + $0x1e]] }
  0x16   :  { %v72_v3 = vmul.f32 %v71_v2, %v25_v0  ;;  %v36_v5 = vmul.f32 %v35_v4, %v25_v0  ;;  %v73_v6 = vmul.f32 %v71_v2, %v498_v1  ;;  %v37_v7 = vmul.f32 %v35_v4, %v498_v1  ;;  %s532_s6 = sld [smem:[#allocation2 + $0x1c]]  ;;  %s534_s7 = sld [smem:[#allocation2 + $0x1f]] }
  0x17   :  { %v49_v8 = vstv %s361_s16  ;;  %v85_v11 = vstv %s365_s20  ;;  %s536_s8 = sld [smem:[#allocation2 + $0x12]]  ;;  %s538_s9 = sld [smem:[#allocation2 + $0x9]] }
  0x18   :  { %76 = vrot.lane.b32.xlu1 %v72_v3, %s462_s21  ;;  %40 = vrot.lane.b32.xlu0 %v36_v5, %s462_s21  ;;  %v51_v9 = vmul.f32 %v49_v8, %v498_v1  ;;  %v50_v10 = vmul.f32 %v49_v8, %v25_v0  ;;  %v87_v12 = vmul.f32 %v85_v11, %v498_v1  ;;  %s540_s10 = sld [smem:[#allocation2 + $0x13]]  ;;  %s542_s11 = sld [smem:[#allocation2 + $0x20]]  ;;  %v67_v16 = vstv %s518_s27 }
  0x19   :  { %v86_v13 = vmul.f32 %v85_v11, %v25_v0  ;;  %s544_s12 = sld [smem:[#allocation2 + $0xa]]  ;;  %s546_s13 = sld [smem:[#allocation2 + $0x21]]  ;;  %v31_v18 = vstv %s30_s28  ;;  %v68_v20 = vmul.f32 %v67_v16, %v25_v0  ;;  %v69_v23 = vmul.f32 %v67_v16, %v498_v1 }
  0x1a   :  { %s548_s14 = sld [smem:[#allocation2 + $0x22]]  ;;  %s550_s15 = sld [smem:[#allocation2 + $0x15]]  ;;  %v32_v21 = vmul.f32 %v31_v18, %v25_v0  ;;  %v33_v22 = vmul.f32 %v31_v18, %v498_v1  ;;  %v63_v25 = vstv %s520_s29  ;;  %v99_v26 = vstv %s522_s30 }
  0x1b   :  { %s552_s16 = sld [smem:[#allocation2 + $0xc]]  ;;  %s555_s17 = sld [smem:[#allocation2 + $0x16]]  ;;  %v103_v27 = vstv %s524_s3  ;;  %v107_v29 = vstv %s526_s1  ;;  %v119_v30 = vstv %s528_s4  ;;  %v123_v31 = vstv %s530_s5 }
  0x1c   :  { %78 = vrot.lane.b32.xlu1 %v73_v6, %s462_s21  ;;  %42 = vrot.lane.b32.xlu0 %v37_v7, %s462_s21  ;;  %s557_s18 = sld [smem:[#allocation2 + $0xd]]  ;;  %s559_s0 = sld [smem:[#allocation2 + $0x18]]  ;;  %v143_v32 = vstv %s532_s6  ;;  %v147_v33 = vstv %s534_s7 }
  0x1d   :  { %s561_s19 = sld [smem:[#allocation2 + $0x11]]  ;;  %s563_s20 = sld [smem:[#allocation2 + $0xf]]  ;;  %v239_v34 = vstv %s536_s8  ;;  %v209_v35 = vstv %s538_s9 }
  0x1e   :  { %s570_s23 = sld [smem:[#allocation2 + $0x14]]  ;;  %s576_s24 = sld [smem:[#allocation2 + $0x17]]  ;;  %v249_v36 = vstv %s540_s10  ;;  %v113_v38 = vstv %s542_s11 }
  0x1f   :  { %s578_s25 = sld [smem:[#allocation2 + $0x8]]  ;;  %s584_s26 = sld [smem:[#allocation2 + $0xb]]  ;;  %v129_v39 = vstv %s546_s13  ;;  %v219_v40 = vstv %s544_s12 }
  0x20   :  { %56 = vrot.lane.b32.xlu1 %v51_v9, %s463_s22  ;;  %54 = vrot.lane.b32.xlu0 %v50_v10, %s463_s22  ;;  %v153_v43 = vstv %s548_s14  ;;  %v242_v44 = vstv %s550_s15  ;;  %s607_s27 = sld [smem:[#allocation2 + $0xe]]  ;;  %s464_s28 = smov 1  }
  0x21   :  { %v212_v45 = vstv %s552_s16  ;;  %v252_v48 = vstv %s555_s17  ;;  %s465_s29 = smov 2   ;;  %s466_s30 = smov 3  }
  0x22   :  { %v222_v49 = vstv %s557_s18  ;;  %v246_v52 = vstv %s559_s0  ;;  %s467_s3 = smov 4   ;;  %s468_s1 = smov 5  }
  0x23   :  { %v229_v50 = vstv %s561_s19  ;;  %v216_v53 = vstv %s563_s20  ;;  %s469_s4 = smov 6   ;;  %s470_s5 = smov [#allocation5]  }
  0x24   :  { %92 = vrot.lane.b32.xlu1 %v87_v12, %s463_s22  ;;  %90 = vrot.lane.b32.xlu0 %v86_v13, %s463_s22  ;;  %v232_v58 = vstv %s570_s23  ;;  %v236_v62 = vstv %s576_s24  ;;  %s346_s6 = sshll.u32 %s470_s5, 4  ;;  %s347_s6 = int_to_ptr.vmem [resolvable:$true] %s346_s6 }
  0x25   :  { %v199_v63 = vstv %s578_s25  ;;  %v202_v4 = vstv %s584_s26  ;;  %s435_s7 = scalar_lea.vmem %s347_s6, 256  ;;  %p440_p6 = scmp.lt.s32.totalorder %s347_s6, %s347_s6 }
  0x26   :  { %p436_p5 = scmp.ne.s32.totalorder %s347_s6, %s435_s7  ;;  %p441_p7 = scmp.lt.s32.totalorder %s435_s7, %s435_s7 }
  0x28   :  { %136 = vrot.lane.b32.xlu1 %v507_v14, %s462_s21  ;;  %134 = vrot.lane.b32.xlu0 %v512_v15, %s462_s21  ;;  %s565_s21 = sld [smem:[#allocation2 + $0x19]]  ;;  %p442_p8 = por %p441_p7, %p440_p6 }
  0x2a   :  { %p443_p9 = pnand %p442_p8, %p436_p5 }
  0x2c   :  { %158 = vrot.lane.b32.xlu1 %v507_v14, %s463_s22  ;;  %156 = vrot.lane.b32.xlu0 %v512_v15, %s463_s22  ;;  %s568_s22 = sld [smem:[#allocation2 + $0x10]] }
  0x2e   :  { %v256_v54 = vstv %s565_s21 }
  0x32   :  { %v226_v57 = vstv %s568_s22 }
  0x8a   :  { %v77_v17 = vpop.permute.xlu1 %76  ;;  %v41_v19 = vpop.permute.xlu0 %40 }
  0x8b   :  { %v46_v41 = vadd.f32 %v41_v19, %v32_v21  ;;  %v82_v59 = vadd.f32 %v77_v17, %v68_v20 }
  0x8e   :  { %v79_v24 = vpop.permute.xlu1 %78  ;;  %v43_v28 = vpop.permute.xlu0 %42 }
  0x8f   :  { %v47_v37 = vadd.f32 %v43_v28, %v33_v22  ;;  %v83_v55 = vadd.f32 %v79_v24, %v69_v23 }
  0x92   :  { %v57_v42 = vpop.permute.xlu1 %56  ;;  %v55_v47 = vpop.permute.xlu0 %54 }
  0x93   :  { %v61_v46 = vadd.f32 %v57_v42, %v47_v37  ;;  %v60_v51 = vadd.f32 %v55_v47, %v46_v41 }
  0x95   :  { %v65_v56 = vadd.f32 %v63_v25, %v61_v46  ;;  %v64_v60 = vadd.f32 %v63_v25, %v60_v51 }
  0x96   :  { %v93_v61 = vpop.permute.xlu1 %92  ;;  %v91_v1 = vpop.permute.xlu0 %90 }
  0x97   :  { %v97_v0 = vadd.f32 %v93_v61, %v83_v55  ;;  %v105_v2 = vmul.f32 %v103_v27, %v65_v56  ;;  %v121_v3 = vmul.f32 %v119_v30, %v65_v56  ;;  %v96_v5 = vadd.f32 %v91_v1, %v82_v59 }
  0x98   :  { %v104_v6 = vmul.f32 %v103_v27, %v64_v60  ;;  %v120_v7 = vmul.f32 %v119_v30, %v64_v60  ;;  %v145_v8 = vmul.f32 %v143_v32, %v65_v56  ;;  %v144_v10 = vmul.f32 %v143_v32, %v64_v60 }
  0x99   :  { %v101_v9 = vadd.f32 %v99_v26, %v97_v0  ;;  %v240_v11 = vmul.f32 %v239_v34, %v65_v56  ;;  %v210_v12 = vmul.f32 %v209_v35, %v64_v60  ;;  %v100_v13 = vadd.f32 %v99_v26, %v96_v5 }
  0x9a   :  { %v137_v16 = vpop.permute.xlu1 %136  ;;  %v250_v17 = vmul.f32 %v249_v36, %v65_v56  ;;  %v220_v18 = vmul.f32 %v219_v40, %v64_v60  ;;  %v230_v19 = vmul.f32 %v229_v50, %v65_v56  ;;  %v135_v22 = vpop.permute.xlu0 %134  ;;  %v200_v59 = vmul.f32 %v199_v63, %v64_v60 }
  0x9b   :  { %v109_v20 = vmul.f32 %v107_v29, %v101_v9  ;;  %v125_v21 = vmul.f32 %v123_v31, %v101_v9  ;;  %v149_v23 = vmul.f32 %v147_v33, %v101_v9  ;;  %v243_v24 = vmul.f32 %v242_v44, %v101_v9 }
  0x9c   :  { %v108_v25 = vmul.f32 %v107_v29, %v100_v13  ;;  %v124_v27 = vmul.f32 %v123_v31, %v100_v13  ;;  %v148_v28 = vmul.f32 %v147_v33, %v100_v13  ;;  %v213_v30 = vmul.f32 %v212_v45, %v100_v13 }
  0x9d   :  { %v111_v26 = vadd.f32 %v109_v20, %v105_v2  ;;  %v127_v32 = vadd.f32 %v125_v21, %v121_v3  ;;  %v151_v34 = vadd.f32 %v149_v23, %v145_v8  ;;  %v244_v35 = vadd.f32 %v243_v24, %v240_v11 }
  0x9e   :  { %v110_v36 = vadd.f32 %v108_v25, %v104_v6  ;;  %v126_v37 = vadd.f32 %v124_v27, %v120_v7  ;;  %v150_v40 = vadd.f32 %v148_v28, %v144_v10  ;;  %v214_v41 = vadd.f32 %v213_v30, %v210_v12  ;;  %v159_v33 = vpop.permute.xlu1 %158  ;;  %v157_v56 = vpop.permute.xlu0 %156 }
  0x9f   :  { %v115_v29 = vadd.f32 %v113_v38, %v111_v26  ;;  %v131_v31 = vadd.f32 %v129_v39, %v127_v32  ;;  %v155_v42 = vadd.f32 %v153_v43, %v151_v34  ;;  %v615_v44 = vadd.f32 %v246_v52, %v244_v35 }
  0xa0   :  { %v114_v45 = vadd.f32 %v113_v38, %v110_v36  ;;  %v130_v46 = vadd.f32 %v129_v39, %v126_v37  ;;  %v154_v47 = vadd.f32 %v153_v43, %v150_v40  ;;  %v623_v50 = vadd.f32 %v216_v53, %v214_v41 }
  0xa1   :  { %v117_v51 = vadd.f32 %v507_v14, %v115_v29  ;;  %v141_v55 = vadd.f32 %v137_v16, %v131_v31  ;;  %290 = vrot.lane.b32.xlu1 %v615_v44, %s464_s28  ;;  %v253_v52 = vmul.f32 %v252_v48, %v101_v9  ;;  %v163_v61 = vadd.f32 %v159_v33, %v155_v42 }
  0xa2   :  { %v116_v38 = vadd.f32 %v512_v15, %v114_v45  ;;  %v140_v39 = vadd.f32 %v135_v22, %v130_v46  ;;  %284 = vrot.lane.b32.xlu0 %v623_v50, %s464_s28  ;;  %v223_v43 = vmul.f32 %v222_v49, %v100_v13  ;;  %v233_v0 = vmul.f32 %v232_v58, %v101_v9 }
  0xa3   :  { %v165_v14 = vmax.f32 %v117_v51, %v141_v55  ;;  %v254_v53 = vadd.f32 %v253_v52, %v250_v17  ;;  %v203_v1 = vmul.f32 %v202_v4, %v100_v13  ;;  %v162_v3 = vadd.f32 %v157_v56, %v154_v47 }
  0xa4   :  { %v164_v2 = vmax.f32 %v116_v38, %v140_v39  ;;  %v224_v48 = vadd.f32 %v223_v43, %v220_v18  ;;  %v206_v5 = vstv %s607_s27  ;;  %v234_v63 = vadd.f32 %v233_v0, %v230_v19 }
  0xa5   :  { %v167_v60 = vmax.f32 %v165_v14, %v163_v61  ;;  %v638_v15 = vadd.f32 %v256_v54, %v254_v53  ;;  %v204_v6 = vadd.f32 %v203_v1, %v200_v59  ;;  %v471_v1 = vmov 0.0  }
  0xa6   :  { %v166_v7 = vmax.f32 %v164_v2, %v162_v3  ;;  %v642_v8 = vadd.f32 %v226_v57, %v224_v48  ;;  %v237_v4 = vadd.f32 %v236_v62, %v234_v63 }
  0xa7   :  { %v169_v49 = vsub.f32 %v117_v51, %v167_v60  ;;  %v175_v10 = vsub.f32 %v141_v55, %v167_v60  ;;  %v181_v58 = vsub.f32 %v163_v61, %v167_v60  ;;  %312 = vrot.lane.b32.xlu1 %v638_v15, %s465_s29  ;;  %v207_v54 = vadd.f32 %v206_v5, %v204_v6 }
  0xa8   :  { %v168_v9 = vsub.f32 %v116_v38, %v166_v7  ;;  %v174_v11 = vsub.f32 %v140_v39, %v166_v7  ;;  %306 = vrot.lane.b32.xlu0 %v642_v8, %s465_s29  ;;  %v180_v17 = vsub.f32 %v162_v3, %v166_v7  ;;  %271 = vst.msk [vmem:[#allocation5 + $0x8] sm:$0xff] %vm268_vm0, %v237_v4 }
  0xa9   :  { %v172_v12 = vmul.f32 1.442695, %v169_v49  ;;  %v178_v13 = vmul.f32 1.442695, %v175_v10  ;;  %v184_v16 = vmul.f32 1.442695, %v181_v58 }
  0xaa   :  { %v170_v57 = vmul.f32 1.442695, %v168_v9  ;;  %269 = vst.msk [vmem:[#allocation5] sm:$0xff] %vm268_vm0, %v207_v54  ;;  %v176_v18 = vmul.f32 1.442695, %v174_v11 }
  0xab   :  { %407 = vpow2.f32 %v172_v12  ;;  %v182_v19 = vmul.f32 1.442695, %v180_v17 }
  0xac   :  { %409 = vpow2.f32 %v178_v13 }
  0xad   :  { %411 = vpow2.f32 %v184_v16 }
  0xae   :  { %413 = vpow2.f32 %v170_v57 }
  0xaf   :  { %415 = vpow2.f32 %v176_v18 }
  0xb0   :  { %417 = vpow2.f32 %v182_v19 }
  0xb5   :  { %v408_v62 = vpop.eup %407 }
  0xb6   :  { %v410_v20 = vpop.eup %409 }
  0xb7   :  { %v412_v21 = vpop.eup %411  ;;  %v187_v22 = vadd.f32 %v410_v20, %v408_v62 }
  0xb8   :  { %v414_v23 = vpop.eup %413 }
  0xb9   :  { %v416_v24 = vpop.eup %415  ;;  %v189_v25 = vadd.f32 %v412_v21, %v187_v22 }
  0xba   :  { %v186_v27 = vadd.f32 %v416_v24, %v414_v23  ;;  %v418_v28 = vpop.eup %417 }
  0xbb   :  { %419 = vrcp.f32 %v189_v25 }
  0xbc   :  { %v188_v30 = vadd.f32 %v418_v28, %v186_v27 }
  0xbe   :  { %421 = vrcp.f32 %v188_v30 }
  0xc5   :  { %v420_v26 = vpop.eup %419 }
  0xc6   :  { %v193_v32 = vmul.f32 %v420_v26, %v408_v62  ;;  %v195_v34 = vmul.f32 %v420_v26, %v410_v20  ;;  %v197_v29 = vmul.f32 %v420_v26, %v412_v21 }
  0xc8   :  { %v422_v35 = vpop.eup %421  ;;  %276 = vrot.lane.b32.xlu1 %v193_v32, %s466_s30  ;;  %v259_v40 = vmul.f32 %v237_v4, %v193_v32  ;;  %v262_v41 = vmul.f32 %v615_v44, %v195_v34  ;;  %v266_v46 = vmul.f32 %v638_v15, %v197_v29 }
  0xc9   :  { %v192_v36 = vmul.f32 %v422_v35, %v414_v23  ;;  %v194_v37 = vmul.f32 %v422_v35, %v416_v24  ;;  %v196_v45 = vmul.f32 %v422_v35, %v418_v28 }
  0xca   :  { %v263_v42 = vadd.f32 %v262_v41, %v259_v40 }
  0xcb   :  { %274 = vrot.lane.b32.xlu0 %v192_v36, %s466_s30  ;;  %v258_v31 = vmul.f32 %v207_v54, %v192_v36  ;;  %v260_v33 = vmul.f32 %v623_v50, %v194_v37  ;;  %v264_v55 = vmul.f32 %v642_v8, %v196_v45 }
  0xcc   :  { %298 = vrot.lane.b32.xlu1 %v195_v34, %s467_s3  ;;  %v267_v51 = vadd.f32 %v266_v46, %v263_v42 }
  0xcd   :  { %v261_v47 = vadd.f32 %v260_v33, %v258_v31 }
  0xcf   :  { %296 = vrot.lane.b32.xlu0 %v194_v37, %s467_s3  ;;  %v265_v44 = vadd.f32 %v264_v55, %v261_v47 }
  0xd0   :  { %320 = vrot.lane.b32.xlu1 %v197_v29, %s468_s1 }
  0xd3   :  { %318 = vrot.lane.b32.xlu0 %v196_v45, %s468_s1 }
  0xd4   :  { %334 = vrot.lane.b32.xlu1 %v267_v51, %s469_s4 }
  0xd7   :  { %328 = vrot.lane.b32.xlu0 %v265_v44, %s469_s4 }
 0x113   :  { %v291_v56 = vpop.permute.xlu1 %290 }
 0x114   :  { %v285_v52 = vpop.permute.xlu0 %284 }
 0x119   :  { %v313_v59 = vpop.permute.xlu1 %312 }
 0x11a   :  { %v307_v50 = vpop.permute.xlu0 %306 }
 0x13a   :  { %v277_v38 = vpop.permute.xlu1 %276 }
 0x13b   :  { %282 = vst.msk [vmem:[#allocation5 + $0x8] sm:$0xff] %vm280_vm1, %v277_v38 }
 0x13c   :  { %293 = vst.msk [vmem:[#allocation5 + $0x8] sm:$0xff] %vm287_vm2, %v291_v56 }
 0x13d   :  { %v275_v39 = vpop.permute.xlu0 %274 }
 0x13e   :  { %281 = vst.msk [vmem:[#allocation5] sm:$0xff] %vm280_vm1, %v275_v39  ;;  %v299_v61 = vpop.permute.xlu1 %298 }
 0x13f   :  { %304 = vst.msk [vmem:[#allocation5 + $0x8] sm:$0xff] %vm302_vm3, %v299_v61 }
 0x140   :  { %288 = vst.msk [vmem:[#allocation5] sm:$0xff] %vm287_vm2, %v285_v52 }
 0x141   :  { %315 = vst.msk [vmem:[#allocation5 + $0x8] sm:$0xff] %vm309_vm4, %v313_v59  ;;  %v297_v43 = vpop.permute.xlu0 %296 }
 0x142   :  { %303 = vst.msk [vmem:[#allocation5] sm:$0xff] %vm302_vm3, %v297_v43  ;;  %v321_v14 = vpop.permute.xlu1 %320 }
 0x143   :  { %326 = vst.msk [vmem:[#allocation5 + $0x8] sm:$0xff] %vm324_vm5, %v321_v14 }
 0x144   :  { %310 = vst.msk [vmem:[#allocation5] sm:$0xff] %vm309_vm4, %v307_v50 }
 0x145   :  { %v319_v53 = vpop.permute.xlu0 %318 }
 0x146   :  { %325 = vst.msk [vmem:[#allocation5] sm:$0xff] %vm324_vm5, %v319_v53  ;;  %v335_v0 = vpop.permute.xlu1 %334 }
 0x147   :  { %337 = vst.msk [vmem:[#allocation5 + $0x8] sm:$0xff] %vm331_vm6, %v335_v0 }
 0x148   :  { %340 = vst.msk [vmem:[#allocation5 + $0x8] sm:$0xff] %vm338_vm7, %v471_v1 }
 0x149   :  { %v329_v2 = vpop.permute.xlu0 %328 }
 0x14a   :  { %332 = vst.msk [vmem:[#allocation5] sm:$0xff] %vm331_vm6, %v329_v2 }
 0x14b   :  { %339 = vst.msk [vmem:[#allocation5] sm:$0xff] %vm338_vm7, %v471_v1 }
 0x14c   :  { %446 = shalt.err (!%p443_p9)
}
 0x14d   :  { %s447_s10 = scalar_lea.hbm %s668_s2, 256 }
 0x14e   :  { %p448_p10 = scmp.ne.s32.totalorder %s668_s2, %s447_s10  ;;  %p451_p11 = scmp.lt.u32.totalorder %s447_s10, %s668_s2 }
 0x150   :  { %p453_p12 = pnand %p451_p11, %p448_p10 }
 0x152   :  { %456 = shalt.err (!%p453_p12)
}
 0x153   :  { %s472_s15 = smov 128   ;;  %s473_s16 = smov 8  }
 0x154   :  { %352 = dma.vmem_to_hbm [thread:$0]  %s347_s6, 256, %s668_s2, [#allocation3], %s472_s15, %s472_s15, %s473_s16  }
 0x155   :  { %459 = dma.done.wait [#allocation3], 256  }
 0x156   :  { %460 = vsyncadd [#allocation3], 4294967040 }
 0x157   :  { %356 = vsyncpa [#allocation3], 1 }
 0x158   :  { %357 = vsyncpa [#allocation4], 1 }

</bundles_post_ra>
